<compile_context>
chip_gen: v7x
topology: tpu7x:2x2x1
jax: 0.10.0
libtpu: 0.0.40
codegen_flags: <defaults>
</compile_context>

<pallas_src>
import jax
import jax.numpy as jnp
from jax.experimental import pallas as pl
from jax.experimental.pallas import tpu as pltpu


def _round_up(x: int, m: int) -> int:
    return (x + m - 1) // m * m


def _largest_divisor(dim: int, candidates) -> int:
    for c in candidates:
        if c <= dim and dim % c == 0:
            return c
    return dim


# --------------------------------------------------------------------------
# Kernels
# --------------------------------------------------------------------------
def _proj_kernel_single_k(x_ref, w_ref, b_ref, out_ref):
    """out = x @ W + b for one (tm, tn) tile, full D reduction in one dot.

    x_ref:   (tm, D)  bf16   masked token features
    w_ref:   (D, tn)  bf16   projection weight tile (resident across m)
    b_ref:   (1, tn)  f32    bias tile
    out_ref: (tm, tn) bf16   encoder output tile
    """
    acc = jnp.dot(x_ref[...], w_ref[...], preferred_element_type=jnp.float32)
    out_ref[...] = (acc + b_ref[...]).astype(out_ref.dtype)


def _proj_kernel_split_k(x_ref, w_ref, b_ref, out_ref, acc_ref):
    """Split-K fallback (only used when D is too large for a resident tile)."""
    k = pl.program_id(2)

    @pl.when(k == 0)
    def _init():
        acc_ref[...] = jnp.zeros_like(acc_ref)

    acc_ref[...] += jnp.dot(
        x_ref[...], w_ref[...], preferred_element_type=jnp.float32
    )

    @pl.when(k == pl.num_programs(2) - 1)
    def _finalize():
        out_ref[...] = (acc_ref[...] + b_ref[...]).astype(out_ref.dtype)


# --------------------------------------------------------------------------
# Tiling plan + pallas_call wrapper
# --------------------------------------------------------------------------
def _plan_projection(M: int, D: int, N_pad: int):
    """Pick (tm, tn, tk, M_pad, split_k) for the projection matmul."""
    # Rows: fit M exactly when small (no wasted padded rows); 512-wide tiles
    # (~85% of HBM roofline measured) for large M.  16-row min for bf16 packing.
    if M <= 512:
        tm = _round_up(M, 16)
        M_pad = tm
    else:
        tm = 512
        M_pad = _round_up(M, tm)

    # Lane-dense output width (N_pad is already a multiple of 128).
    tn = _largest_divisor(N_pad, (1024, 512, 256, 128))

    # v7x megacore: make sure the parallel axes have >= 2 grid steps when cheap.
    if (M_pad // tm) * (N_pad // tn) == 1 and N_pad >= 256 and N_pad % 256 == 0:
        tn = N_pad // 2  # still a multiple of 128

    # Double-buffered VMEM footprint (bytes) for a given reduction chunk tk.
    def footprint(tk, split):
        f = 2 * (tm * tk * 2 + tk * tn * 2 + tm * tn * 2) + tn * 4
        if split:
            f += tm * tn * 4  # f32 accumulator scratch
        return f

    budget = 24 * 1024 * 1024
    # Prefer single-K (tk = D): removes acc RMW traffic and weight re-streaming.
    # If D is not a multiple of 128 the block must span the full dim anyway.
    if footprint(D, False) <= budget or D % 128 != 0:
        return tm, tn, D, M_pad, False

    tk = D
    for c in (2048, 1024, 512, 256, 128):
        if D % c == 0 and footprint(c, True) <= budget:
            tk = c
            break
    split = tk != D
    return tm, tn, tk, M_pad, split


def _projection_pallas(x_bf16, w_bf16, b_f32):
    """Tiled (M, D) @ (D, N_pad) + b; bf16 MXU, f32 accumulate, bf16 out."""
    M, D = x_bf16.shape
    _, N_pad = w_bf16.shape  # already a multiple of 128 (lane-dense)

    tm, tn, tk, M_pad, split = _plan_projection(M, D, N_pad)
    if M_pad != M:
        x_bf16 = jnp.pad(x_bf16, ((0, M_pad - M), (0, 0)))

    cost = pl.CostEstimate(
        flops=2 * M_pad * D * N_pad,
        transcendentals=0,
        bytes_accessed=M_pad * D * 2 + D * N_pad * 2 + M_pad * N_pad * 2 + N_pad * 4,
    )

    if not split:
        # N outer, M inner: the (D, tn) weight tile stays resident while the
        # M tiles stream through.
        grid = (N_pad // tn, M_pad // tm)
        grid_spec = pltpu.PrefetchScalarGridSpec(
            num_scalar_prefetch=0,
            grid=grid,
            in_specs=[
                pl.BlockSpec((tm, D), lambda n, m: (m, 0)),   # streamed
                pl.BlockSpec((D, tn), lambda n, m: (0, n)),   # resident across m
                pl.BlockSpec((1, tn), lambda n, m: (0, n)),
            ],
            out_specs=pl.BlockSpec((tm, tn), lambda n, m: (m, n)),
        )
        kernel = _proj_kernel_single_k
        dims = ("parallel", "parallel")
    else:
        grid = (N_pad // tn, M_pad // tm, D // tk)
        grid_spec = pltpu.PrefetchScalarGridSpec(
            num_scalar_prefetch=0,
            grid=grid,
            in_specs=[
                pl.BlockSpec((tm, tk), lambda n, m, k: (m, k)),
                pl.BlockSpec((tk, tn), lambda n, m, k: (k, n)),
                pl.BlockSpec((1, tn), lambda n, m, k: (0, n)),
            ],
            out_specs=pl.BlockSpec((tm, tn), lambda n, m, k: (m, n)),
            scratch_shapes=[pltpu.VMEM((tm, tn), jnp.float32)],
        )
        kernel = _proj_kernel_split_k
        dims = ("parallel", "parallel", "arbitrary")

    out = pl.pallas_call(
        kernel,
        out_shape=jax.ShapeDtypeStruct((M_pad, N_pad), jnp.bfloat16),
        grid_spec=grid_spec,
        compiler_params=pltpu.CompilerParams(
            dimension_semantics=dims,
            vmem_limit_bytes=48 * 1024 * 1024,  # fits v7x (64 MiB physical)
        ),
        cost_estimate=cost,
    )(x_bf16, w_bf16, b_f32)

    if M_pad != M:
        out = out[:M]
    return out


# --------------------------------------------------------------------------
# Forward (FairseqEncoderModel.forward equivalent)
# --------------------------------------------------------------------------
@jax.jit
def fairseq_encoder_model_forward(src_tokens, src_lengths, embed_tokens, w_out, b_out):
    """Equivalent of FairseqEncoderModel.forward(src_tokens, src_lengths).

    Returns a fairseq-style encoder output dict:
      {'encoder_out': (B, T, N) bfloat16, 'encoder_padding_mask': (B, T) bool}
    """
    B, T = src_tokens.shape
    V, D = embed_tokens.shape
    N = w_out.shape[1]
    N_pad = _round_up(max(N, 128), 128)  # lane-dense output width

    # --- extract_features: real gather (O(M*D) bytes) in bf16 so that
    # gather -> mask feeds the kernel in a single fused HBM pass.
    ids = jnp.clip(src_tokens.astype(jnp.int32), 0, V - 1)
    x = jnp.take(embed_tokens.astype(jnp.bfloat16), ids, axis=0)  # (B, T, D)

    # --- padding mask from src_lengths; zero out padded positions (bf16).
    positions = jnp.arange(T, dtype=jnp.int32)[None, :]
    padding_mask = positions >= src_lengths.astype(jnp.int32)[:, None]  # (B, T)
    x = x * (~padding_mask)[..., None].astype(x.dtype)

    # --- projection weights: bf16, padded to a multiple of 128 output lanes.
    w_bf16 = w_out.astype(jnp.bfloat16)
    b_f32 = b_out.reshape(1, N).astype(jnp.float32)
    if N_pad != N:
        w_bf16 = jnp.pad(w_bf16, ((0, 0), (0, N_pad - N)))
        b_f32 = jnp.pad(b_f32, ((0, 0), (0, N_pad - N)))

    # --- feature projection in Pallas (bf16 MXU, f32 accumulate, bf16 out).
    out = _projection_pallas(x.reshape(B * T, D), w_bf16, b_f32)
    if N_pad != N:
        out = out[:, :N]
    out = out.reshape(B, T, N)

    return {"encoder_out": out, "encoder_padding_mask": padding_mask}


if __name__ == "__main__":
    # Small deterministic shapes consistent with the forward signature:
    # src_tokens (batch, src_len), src_lengths (batch) -> (batch, src_len, features).
    B, T = 2, 8               # batch, src_len
    V, D, N = 128, 128, 256   # vocab, embed dim, output feature dim

    key = jax.random.PRNGKey(0)
    k_tok, k_emb, k_w, k_b = jax.random.split(key, 4)

    src_tokens = jax.random.randint(k_tok, (B, T), 0, V, dtype=jnp.int32)
    src_lengths = jnp.array([T, T - 3], dtype=jnp.int32)
    embed_tokens = jax.random.normal(k_emb, (V, D), dtype=jnp.float32) * 0.02
    w_out = jax.random.normal(k_w, (D, N), dtype=jnp.float32) * 0.02
    b_out = jax.random.normal(k_b, (N,), dtype=jnp.float32) * 0.02

    net_output = fairseq_encoder_model_forward(
        src_tokens, src_lengths, embed_tokens, w_out, b_out
    )
    enc_out = jax.block_until_ready(net_output["encoder_out"])
    pad_mask = net_output["encoder_padding_mask"]

    # Pure-JAX reference (same bf16 rounding of inputs, f32 math).
    feats = jnp.take(embed_tokens, src_tokens, axis=0)
    ref_mask = jnp.arange(T)[None, :] >= src_lengths[:, None]
    feats = jnp.where(ref_mask[..., None], 0.0, feats)
    feats_bf = feats.astype(jnp.bfloat16).astype(jnp.float32)
    w_bf = w_out.astype(jnp.bfloat16).astype(jnp.float32)
    ref = (
        jnp.einsum("btd,dn->btn", feats_bf, w_bf,
                   precision=jax.lax.Precision.HIGHEST)
        + b_out
    )

    assert enc_out.shape == (B, T, N), enc_out.shape
    assert enc_out.dtype == jnp.bfloat16
    assert bool(jnp.all(pad_mask == ref_mask))
    assert jnp.allclose(enc_out.astype(jnp.float32), ref, atol=2e-3, rtol=2e-2)

    print("KERNEL_OK")
</pallas_src>

<mosaic_0001>
module attributes {stable_mosaic.version = 11 : i64} {
  func.func @_proj_kernel_single_k(%arg0: i32, %arg1: i32, %arg2: memref<16x128xbf16, #tpu.memory_space<vmem>>, %arg3: memref<128x128xbf16, #tpu.memory_space<vmem>>, %arg4: memref<1x128xf32, #tpu.memory_space<vmem>>, %arg5: memref<16x128xbf16, #tpu.memory_space<vmem>>) attributes {dimension_semantics = [#tpu.dimension_semantics<parallel>, #tpu.dimension_semantics<parallel>], iteration_bounds = array<i64: 2, 1>, scalar_prefetch = 0 : i64, scratch_operands = 0 : i64, tpu.core_type = #tpu.core_type<tc>, window_params = [{transform_indices = @transform_0, window_bounds = array<i64: 16, 128>}, {transform_indices = @transform_1, window_bounds = array<i64: 128, 128>}, {transform_indices = @transform_2, window_bounds = array<i64: 1, 128>}, {transform_indices = @transform_3, window_bounds = array<i64: 16, 128>}]} {
    %c0 = arith.constant 0 : index
    %c0_0 = arith.constant 0 : index
    %0 = vector.load %arg2[%c0, %c0_0] : memref<16x128xbf16, #tpu.memory_space<vmem>>, vector<16x128xbf16>
    %c0_1 = arith.constant 0 : index
    %c0_2 = arith.constant 0 : index
    %1 = vector.load %arg3[%c0_1, %c0_2] : memref<128x128xbf16, #tpu.memory_space<vmem>>, vector<128x128xbf16>
    %cst = arith.constant dense<0.000000e+00> : vector<16x128xf32>
    %2 = tpu.matmul %0, %1, %cst {dimension_numbers = #tpu.dot_dimension_numbers<[1], [0], [0], [1], [0, 0, 1, 1], [], []>} : vector<16x128xbf16>, vector<128x128xbf16>, vector<16x128xf32> -> vector<16x128xf32>
    %c0_3 = arith.constant 0 : index
    %c0_4 = arith.constant 0 : index
    %3 = vector.load %arg4[%c0_3, %c0_4] : memref<1x128xf32, #tpu.memory_space<vmem>>, vector<1x128xf32>
    %4 = vector.broadcast %3 : vector<1x128xf32> to vector<16x128xf32>
    %5 = arith.addf %2, %4 : vector<16x128xf32>
    %6 = arith.truncf %5 : vector<16x128xf32> to vector<16x128xbf16>
    %c0_5 = arith.constant 0 : index
    %c0_6 = arith.constant 0 : index
    %7 = vector.load %arg5[%c0_5, %c0_6] : memref<16x128xbf16, #tpu.memory_space<vmem>>, vector<16x128xbf16>
    tpu.vector_store %arg5[%c0_5, %c0_6], %6 {strides = array<i32>} : memref<16x128xbf16, #tpu.memory_space<vmem>>, vector<16x128xbf16>,
    return
  }
  func.func @transform_0(%arg0: i32, %arg1: i32) -> (i32, i32) {
    %c0_i32 = arith.constant 0 : i32
    %c0_i32_0 = arith.constant 0 : i32
    return %arg1, %c0_i32 : i32, i32
  }
  func.func @transform_1(%arg0: i32, %arg1: i32) -> (i32, i32) {
    %c0_i32 = arith.constant 0 : i32
    %c0_i32_0 = arith.constant 0 : i32
    return %c0_i32, %arg0 : i32, i32
  }
  func.func @transform_2(%arg0: i32, %arg1: i32) -> (i32, i32) {
    %c0_i32 = arith.constant 0 : i32
    %c0_i32_0 = arith.constant 0 : i32
    return %c0_i32, %arg0 : i32, i32
  }
  func.func @transform_3(%arg0: i32, %arg1: i32) -> (i32, i32) {
    %c0_i32 = arith.constant 0 : i32
    return %arg1, %arg0 : i32, i32
  }
}

</mosaic_0001>

<bundles_post_ra>
// kernel: fairseq_encoder_model_forward.1
= control target key start
LH: loop header
LB: loop body
LE: loop exit
PB: predicated region body
PF: predicated region fallthrough
CT: control target
= control target key end

     0   :  { %8 = vsyncpa [#allocation4], 0  ;;  %s957_s0 = inlined_call_operand.vmem [shape: bf16[16,128], index: 0, kind: input, shape index: {}]   ;;  %s958_s1 = inlined_call_operand.vmem [shape: bf16[128,256], index: 1, kind: input, shape index: {}]   ;;  %s959_s2 = inlined_call_operand.vmem [shape: f32[1,256], index: 2, kind: input, shape index: {}]   ;;  %s960_s3 = inlined_call_operand.hbm [shape: bf16[16,256], index: 3, kind: output, shape index: {}]  }
   0x1   :  { %10 = vsyncpa [#allocation4 + $0x1], 0  ;;  %s807_s12 = smov 0   ;;  %s809_s13 = smov 0  }
   0x2   :  { %s811_s14 = smov 0   ;;  %s813_s15 = smov 0  }
   0x3   :  { %s815_s16 = smov 0   ;;  %s817_s17 = smov 0  }
   0x4 LB: > { %s570_s18 = sadd.s32 4294967295, %s779_s17   ;;  %s571_s19 = sadd.s32 4294967294, %s779_s17   ;;  %s779_s17 = sphi %s817_s17, %s16_s17   ;;  %s775_s16 = sphi %s815_s16, %s967_s16   ;;  %s771_s15 = sphi %s813_s15, %s966_s15   ;;  %s767_s14 = sphi %s811_s14, %s965_s14   ;;  %s763_s13 = sphi %s809_s13, %s964_s13   ;;  %s759_s12 = sphi %s807_s12, %s963_s12  }
   0x5   : > { %s28_s20 = sadd.s32 1, %s775_s16  ;;  %s61_s21 = sadd.s32 1, %s767_s14 }
   0x6   : > { %p30_p0 = scmp.ge.s32.totalorder %s28_s20, 2  ;;  %p68_p1 = scmp.ne.s32.totalorder %s767_s14, %s763_s13 }
   0x7   : > { %p69_p2 = scmp.eq.s32.totalorder %s779_s17, 0  ;;  %p126_p3 = scmp.eq.s32.totalorder %s570_s18, 1 }
   0x8   : > { %s969_s20 = smov (%p30_p0, %s28_s20), 0  ;;  %p131_p6 = scmp.ne.s32.totalorder %s763_s13, %s759_s12 }
   0x9   : > { %p70_p4 = por %p69_p2, %p68_p1  ;;  %p846_p5 = por %p126_p3, %p68_p1 }
   0xa   : > { %s58_s23 = ssub.s32 %s775_s16, %s969_s20  ;;  %p132_p8 = scmp.eq.s32.totalorder %s571_s19, 1 }
   0xb   : > { %p59_p7 = scmp.eq.s32.totalorder %s58_s23, 0  ;;  %p574_p10 = scmp.ge.s32.totalorder %s779_s17, 2 }
   0xc   : > { %p857_p9 = por %p132_p8, %p131_p6 }
   0xd   : > { %s855_s24 = scalar_select %p59_p7, %s767_s14, %s61_s21  }
   0xe   : > { %157 = sbr.rel (%p574_p10) target bundleno = 35 (0x23), region = 20 }
  0x15   : > { %160 = sbr.rel (!%p70_p4) target bundleno = 35 (0x23), region = 24  ;;  %s162_s26 = sand.u32 (%p70_p4), 1, %s767_s14  }
  0x16   : > { %s576_s27 = sshll.u32 (%p70_p4), %s775_s16, 2  ;;  %s575_s28 = sshll.u32 (%p70_p4), %s162_s26, 6 }
  0x17   : > { %s869_s4 = scalar_lea.vmem (%p70_p4), %s958_s1, %s576_s27  ;;  %s164_s5 = scalar_lea.vmem (%p70_p4), [#allocation2], %s575_s28 }
  0x18   : > { %v182_v0 = vld [vmem:[%s869_s4] sm:$0xf] (%p70_p4)  ;;  %v184_v1 = vld [vmem:[%s869_s4 + $0x8] sm:$0xf] (%p70_p4)  ;;  %v186_v2 = vld [vmem:[%s869_s4 + $0x10] sm:$0xf] (%p70_p4) }
  0x19   : > { %183 = vst [vmem:[%s164_s5] sm:$0xf] (%p70_p4), %v182_v0  ;;  %185 = vst [vmem:[%s164_s5 + $0x4] sm:$0xf] (%p70_p4), %v184_v1  ;;  %v188_v3 = vld [vmem:[%s869_s4 + $0x18] sm:$0xf] (%p70_p4) }
  0x1a   : > { %v190_v4 = vld [vmem:[%s869_s4 + $0x20] sm:$0xf] (%p70_p4)  ;;  %187 = vst [vmem:[%s164_s5 + $0x8] sm:$0xf] (%p70_p4), %v186_v2  ;;  %189 = vst [vmem:[%s164_s5 + $0xc] sm:$0xf] (%p70_p4), %v188_v3 }
  0x1b   : > { %191 = vst [vmem:[%s164_s5 + $0x10] sm:$0xf] (%p70_p4), %v190_v4  ;;  %v192_v5 = vld [vmem:[%s869_s4 + $0x28] sm:$0xf] (%p70_p4)  ;;  %v194_v6 = vld [vmem:[%s869_s4 + $0x30] sm:$0xf] (%p70_p4) }
  0x1c   : > { %v196_v7 = vld [vmem:[%s869_s4 + $0x38] sm:$0xf]  ;;  %193 = vst [vmem:[%s164_s5 + $0x14] sm:$0xf] %v192_v5  ;;  %195 = vst [vmem:[%s164_s5 + $0x18] sm:$0xf] %v194_v6 }
  0x1d   : > { %197 = vst [vmem:[%s164_s5 + $0x1c] sm:$0xf] %v196_v7  ;;  %v198_v8 = vld [vmem:[%s869_s4 + $0x40] sm:$0xf]  ;;  %v200_v9 = vld [vmem:[%s869_s4 + $0x48] sm:$0xf] }
  0x1e   : > { %v202_v10 = vld [vmem:[%s869_s4 + $0x50] sm:$0xf]  ;;  %199 = vst [vmem:[%s164_s5 + $0x20] sm:$0xf] %v198_v8  ;;  %201 = vst [vmem:[%s164_s5 + $0x24] sm:$0xf] %v200_v9 }
  0x1f   : > { %203 = vst [vmem:[%s164_s5 + $0x28] sm:$0xf] %v202_v10  ;;  %v204_v11 = vld [vmem:[%s869_s4 + $0x58] sm:$0xf]  ;;  %v206_v12 = vld [vmem:[%s869_s4 + $0x60] sm:$0xf] }
  0x20   : > { %v208_v13 = vld [vmem:[%s869_s4 + $0x68] sm:$0xf]  ;;  %205 = vst [vmem:[%s164_s5 + $0x2c] sm:$0xf] %v204_v11  ;;  %207 = vst [vmem:[%s164_s5 + $0x30] sm:$0xf] %v206_v12 }
  0x21   : > { %209 = vst [vmem:[%s164_s5 + $0x34] sm:$0xf] %v208_v13  ;;  %v210_v14 = vld [vmem:[%s869_s4 + $0x70] sm:$0xf]  ;;  %v212_v15 = vld [vmem:[%s869_s4 + $0x78] sm:$0xf] }
  0x22   : > { %211 = vst [vmem:[%s164_s5 + $0x38] sm:$0xf] %v210_v14  ;;  %213 = vst [vmem:[%s164_s5 + $0x3c] sm:$0xf] %v212_v15 }
  0x23 PF: > { %p577_p11 = scmp.ge.s32.totalorder %s779_s17, 1  ;;  %p273_p12 = scmp.lt.s32.totalorder %s779_s17, 3 }
  0x25   : > { %p274_p13 = pnand %p577_p11, %p273_p12 }
  0x26   : > { %s890_s6 = sand.u32 (!%p274_p13), 1, %s763_s13   ;;  %v781_v16 = vmov (!%p274_p13), 0.0   ;;  %vm782_vm0 = vmmov (!%p274_p13), 0   ;;  %v700_v25 = vld [vmem:[%s957_s0] sm:$0xff] (!%p274_p13)   ;;  %p317_p0 = scmp.lt.s32.totalorder (!%p274_p13), %s771_s15, 1 }
  0x27   : > { %277 = sbr.rel (%p274_p13) target bundleno = 307 (0x133), region = 69  ;;  %612 = vmatprep.subr.bf16.mxu0 (!%p274_p13), %v781_v16  ;;  %s578_s7 = sshll.u32 (!%p274_p13), %s890_s6, 6  ;;  %628 = vmatprep.mubr.msk.bf16.mxu0 (!%p274_p13), %vm782_vm0, %v781_v16 }
  0x28   : > { %s282_s8 = scalar_lea.vmem (!%p274_p13), [#allocation2], %s578_s7  ;;  %s579_s18 = sshll.u32 (!%p274_p13), %s890_s6, 3 }
  0x29   : > { %v692_v17 = vld [vmem:[%s282_s8] sm:$0xff] (!%p274_p13)   ;;  %v693_v18 = vld [vmem:[%s282_s8 + $0x8] sm:$0xff] (!%p274_p13)   ;;  %v694_v19 = vld [vmem:[%s282_s8 + $0x10] sm:$0xff] (!%p274_p13)   ;;  %s310_s26 = scalar_lea.vmem (!%p274_p13), [#allocation3], %s579_s18  ;;  %s593_s28 = sshll.u32 (!%p274_p13), %s771_s15, 6 }
  0x2a   : > { %613 = vmatpush3.bf16.msra.mxu0 (!%p274_p13), %v692_v17  ;;  %v695_v20 = vld [vmem:[%s282_s8 + $0x18] sm:$0xff] (!%p274_p13)   ;;  %v696_v21 = vld [vmem:[%s282_s8 + $0x20] sm:$0xff] (!%p274_p13)   ;;  %v697_v22 = vld [vmem:[%s282_s8 + $0x28] sm:$0xff] (!%p274_p13)   ;;  %s468_s27 = sshll.u32 (!%p274_p13), %s310_s26, 4  ;;  %s908_s4 = scalar_lea.hbm (!%p274_p13), %s960_s3, %s593_s28  ;;  %s903_s27 = int_to_ptr.vmem [resolvable:$true] %s468_s27 }
  0x2b   : > { %614 = vmatprep.subr.bf16.mxu0 (!%p274_p13), %v781_v16  ;;  %v698_v23 = vld [vmem:[%s282_s8 + $0x30] sm:$0xff] (!%p274_p13)   ;;  %v699_v24 = vld [vmem:[%s282_s8 + $0x38] sm:$0xff] (!%p274_p13)   ;;  %s453_s5 = scalar_lea.sflag (!%p274_p13), [#allocation4], %s890_s6  ;;  %s701_s7 = scalar_lea.vmem (!%p274_p13), %s903_s27, 128 }
  0x2c   : > { %p702_p1 = scmp.ne.s32.totalorder (!%p274_p13), %s903_s27, %s701_s7 }
  0x2e   : > { %615 = vmatpush3.bf16.msra.mxu0 %v693_v18  ;;  %s318_s11 = scalar_select %p317_p0, %s771_s15, 1 }
  0x2f   : > { %616 = vmatprep.subr.bf16.mxu0 %v781_v16  ;;  %p703_p2 = pnand %p702_p1, %p846_p5  ;;  %s783_s15 = smov [#allocation3]  }
  0x30   : > { %s319_s23 = scalar_lea.vmem %s959_s2, %s318_s11  ;;  %s705_s8 = sshll.u32 %s783_s15, 4  ;;  %s706_s8 = int_to_ptr.vmem [resolvable:$false] %s705_s8 }
  0x31   : > { %v580_v26 = vld [vmem:[%s319_s23] ss:$0 sm:$0xff]  ;;  %p704_p3 = pneg %p703_p2  ;;  %s707_s9 = scalar_lea.vmem %s706_s8, 256 }
  0x32   : > { %617 = vmatpush3.bf16.msra.mxu0 %v694_v19  ;;  %p708_p4 = scmp.lt.s32.totalorder %s903_s27, %s706_s8  ;;  %p709_p6 = scmp.lt.s32.totalorder %s707_s9, %s701_s7 }
  0x33   : > { %618 = vmatprep.subr.bf16.mxu0 %v781_v16 }
  0x34   : > { %p710_p7 = por %p709_p6, %p708_p4 }
  0x36   : > { %619 = vmatpush3.bf16.msra.mxu0 %v695_v20  ;;  %p711_p8 = pnand %p710_p7, %p704_p3 }
  0x37   : > { %620 = vmatprep.subr.bf16.mxu0 %v781_v16 }
  0x3a   : > { %621 = vmatpush3.bf16.msra.mxu0 %v696_v21 }
  0x3b   : > { %622 = vmatprep.subr.bf16.mxu0 %v781_v16 }
  0x3e   : > { %623 = vmatpush3.bf16.msra.mxu0 %v697_v22 }
  0x3f   : > { %624 = vmatprep.subr.bf16.mxu0 %v781_v16 }
  0x42   : > { %625 = vmatpush3.bf16.msra.mxu0 %v698_v23 }
  0x43   : > { %626 = vmatprep.subr.bf16.mxu0 %v781_v16 }
  0x46   : > { %627 = vmatpush3.bf16.msra.mxu0 %v699_v24 }
  0x49   : > { %629 = vmatmul.mubr.bf16.vlgmr.msra.gmra.mrb[0].mxu0 %v700_v25 }
 0x11c   : > { %v435_v27 = vpop.f32.mrb[0].mxu0 }
 0x11d   : > { %v630_v28 = vpop.f32.mrb[1].mxu0  ;;  %v436_v30 = vadd.f32 %v580_v26, %v435_v27 }
 0x11e   : > { %v438_v29 = vpop.f32.mrb[2].mxu0 }
 0x11f   : > { %v439_v31 = vadd.f32 %v580_v26, %v438_v29  ;;  %v631_v32 = vpop.f32.mrb[3].mxu0 }
 0x121   : > { %v601_v33 = vpack.c.bf16 %v439_v31, %v436_v30 }
 0x123   : > { %602 = vst [vmem:[%s310_s26] sm:$0xff] %v601_v33  }
 0x124   : > { %714 = shalt.err (!%p711_p8)
}
 0x125   : > { %s715_s10 = scalar_lea.hbm %s908_s4, 128  ;;  %s719_s19 = scalar_lea.hbm %s960_s3, 256 }
 0x126   : > { %p716_p11 = scmp.ne.s32.totalorder %s908_s4, %s715_s10  ;;  %p720_p0 = scmp.lt.u32.totalorder %s908_s4, %s960_s3 }
 0x127   : > { %p721_p1 = scmp.lt.u32.totalorder %s719_s19, %s715_s10  ;;  %p723_p3 = scmp.lt.u32.totalorder %s715_s10, %s908_s4 }
 0x128   : > { %p717_p12 = pnand %p716_p11, %p846_p5 }
 0x129   : > { %p722_p2 = por %p721_p1, %p720_p0 }
 0x12a   : > { %p718_p13 = pneg %p717_p12 }
 0x12b   : > { %p724_p4 = por %p723_p3, %p722_p2 }
 0x12d   : > { %p725_p6 = pnand %p724_p4, %p718_p13 }
 0x12f   : > { %728 = shalt.err (!%p725_p6)
}
 0x130   : > { %s784_s26 = smov 64   ;;  %s785_s28 = smov 128  }
 0x131   : > { %s786_s29 = smov 4  }
 0x132   : > { %632 = dma.vmem_to_hbm [thread:$0]  (%p846_p5), %s903_s27, 128, %s908_s4, %s453_s5, %s784_s26, %s785_s28, %s786_s29  }
 0x133 PF: > { %s483_s30 = sand.u32 1, %s759_s12   ;;  %p635_p7 = pnand %p574_p10, %p857_p9 }
 0x134   : > { %s484_s7 = scalar_lea.sflag [#allocation4], %s483_s30 }
 0x135   : > { %754 = dma.done.wait (!%p635_p7), %s484_s7, 128  }
 0x136   : > { %756 = vsyncadd (!%p635_p7), %s484_s7, 4294967168  ;;  %s16_s17 = sadd.s32 1, %s779_s17   ;;  %s963_s12 = smov %s763_s13 }
 0x137   : > { %p13_p8 = scmp.ge.s32.totalorder %s16_s17, 4   ;;  %s964_s13 = smov %s767_s14 }
 0x138   : > { %s965_s14 = smov %s855_s24  ;;  %s966_s15 = smov %s775_s16 }
 0x139   : > { %s967_s16 = smov %s969_s20  ;;  %15 = sbr.rel (!%p13_p8) target bundleno = 4 (0x4), region = 119 }
 0x140   :  { %489 = vsyncpa [#allocation4], 1 }
 0x141   :  { %491 = vsyncpa [#allocation4 + $0x1], 1 }

</bundles_post_ra>
